<compile_context>
chip_gen: v6e
topology: v6e:2x2x1
jax: 0.10.0
libtpu: 0.0.40
codegen_flags: <defaults>
</compile_context>

<pallas_src>
import math
from functools import partial

import jax
import jax.numpy as jnp
from jax.experimental import pallas as pl
from jax.experimental.pallas import tpu as pltpu


def _round_up(x, m):
    return ((x + m - 1) // m) * m


def _vmem_budgets():
    """Generation-aware (scoped_vmem_limit, block_budget) in bytes."""
    try:
        cap = int(pltpu.get_tpu_info().vmem_capacity_bytes)
    except Exception:  # no TPU visible / interpret mode / older runtime
        cap = 128 * 1024 * 1024
    if cap <= 64 * 1024 * 1024:            # v7x: 64 MiB per TensorCore -> leave headroom
        return 40 * 1024 * 1024, 24 * 1024 * 1024
    return 48 * 1024 * 1024, 36 * 1024 * 1024   # v5e / v6e: 128 MiB physical


def _pick_tm(M, in_dim, out_dim, r, *, x_bytes, cdt_bytes, out_bytes, use_gelu, budget):
    """Largest row tile fitting the VMEM budget (streamed tiles are double-buffered)."""
    # sublane packing: 2-byte streaming dtypes want 16-row granules, f32 wants 8
    granule = 8 if (x_bytes >= 4 and out_bytes >= 4) else 16

    # weights + f32 bias: block index is constant but the pipeline still allocates 2 bufs
    resident = 2 * ((in_dim * r + r * out_dim) * cdt_bytes + out_dim * 4)

    # double-buffered streaming tiles (x in native dtype, out in output dtype)
    per_row = 2 * (in_dim * x_bytes + out_dim * out_bytes)
    # single-buffered in-kernel temporaries: x cast copy, h (f32), h cast, f32 accumulator
    if cdt_bytes != x_bytes:
        per_row += in_dim * cdt_bytes
    per_row += r * 4
    if cdt_bytes != 4:
        per_row += r * cdt_bytes
    per_row += out_dim * 4
    if use_gelu:
        per_row += r * 4           # erf/GELU temporaries

    avail = max(budget - resident, per_row * granule)
    tm = min(avail // per_row, 1024)
    # keep >= 4 grid steps when possible: 2 per TensorCore after v7x megacore sharding,
    # so each core still gets pipeline overlap.
    tm = min(tm, _round_up(pl.cdiv(M, 4), granule))
    tm = max(granule, (tm // granule) * granule)
    return int(tm)


def _structured_tuning_kernel(*refs, use_gelu, use_bias, compute_dtype):
    # refs = (x_ref, w1_ref, w2_ref, [b2_ref,] o_ref)
    if use_bias:
        x_ref, w1_ref, w2_ref, b2_ref, o_ref = refs
    else:
        x_ref, w1_ref, w2_ref, o_ref = refs
        b2_ref = None
    # x_ref : (tm, in_dim)  native dtype      w1_ref: (in_dim, r)  compute dtype
    # w2_ref: (r, out_dim)  compute dtype     b2_ref: (1, out_dim) f32
    x = x_ref[...]
    if x.dtype != compute_dtype:
        x = x.astype(compute_dtype)          # in-kernel cast: free on the VPU, saves an HBM pass
    h = jnp.dot(x, w1_ref[...], preferred_element_type=jnp.float32)
    if use_gelu:
        # torch.nn.GELU default is the exact (erf) formulation — keep semantics.
        h = jax.nn.gelu(h, approximate=False)
    # NOTE: h is intentionally down-cast to the compute dtype before the second matmul
    # (bf16 MXU path); accumulation stays f32 via preferred_element_type.
    out = jnp.dot(h.astype(w2_ref.dtype), w2_ref[...], preferred_element_type=jnp.float32)
    if use_bias:
        out = out + b2_ref[...].astype(jnp.float32)
    o_ref[...] = out.astype(o_ref.dtype)


def structured_tuning_forward(x, w1_t, w2_t, b2=None, *, structured_type="lora",
                              compute_dtype=None, tm=None):
    """x: (..., in_dim).  w1_t: (in_dim, r).  w2_t: (r, out_dim).  b2: (out_dim,) or None.

    compute_dtype: optional dtype (e.g. jnp.bfloat16) used for the matmul operands.
    x is streamed at its native dtype and cast inside the kernel; only the (small)
    weights are cast in the wrapper.  Accumulation is f32; output dtype follows x.
    """
    in_dim, r = w1_t.shape
    r2, out_dim = w2_t.shape
    assert r2 == r, "w2_t must be (low_rank_dim, out_dim)"
    lead = x.shape[:-1]
    M = math.prod(lead) if lead else 1
    out_dtype = x.dtype

    cdt = jnp.dtype(compute_dtype) if compute_dtype is not None else jnp.dtype(x.dtype)
    x2 = x.reshape(M, in_dim)                       # no dtype cast here (no extra HBM pass)
    w1c = w1_t.astype(cdt)
    w2c = w2_t.astype(cdt)

    use_bias = b2 is not None
    use_gelu = structured_type == "adapter"

    vmem_limit, block_budget = _vmem_budgets()
    if tm is None:
        tm = _pick_tm(M, in_dim, out_dim, r,
                      x_bytes=jnp.dtype(x.dtype).itemsize,
                      cdt_bytes=cdt.itemsize,
                      out_bytes=jnp.dtype(out_dtype).itemsize,
                      use_gelu=use_gelu,
                      budget=block_budget)
    tm = int(tm)

    operands = [x2, w1c, w2c]
    in_specs = [
        pl.BlockSpec((tm, in_dim), lambda i: (i, 0)),
        pl.BlockSpec((in_dim, r), lambda i: (0, 0)),
        pl.BlockSpec((r, out_dim), lambda i: (0, 0)),
    ]
    if use_bias:
        b2p = jnp.asarray(b2, dtype=jnp.float32).reshape(1, out_dim)
        operands.append(b2p)
        in_specs.append(pl.BlockSpec((1, out_dim), lambda i: (0, 0)))

    grid = (pl.cdiv(M, tm),)

    cost = pl.CostEstimate(
        flops=int(2 * M * r * (in_dim + out_dim)),
        transcendentals=int(M * r) if use_gelu else 0,
        bytes_accessed=int(M * in_dim * jnp.dtype(x.dtype).itemsize
                           + M * out_dim * jnp.dtype(out_dtype).itemsize
                           + (in_dim * r + r * out_dim) * cdt.itemsize
                           + (out_dim * 4 if use_bias else 0)),
    )

    kernel = partial(_structured_tuning_kernel,
                     use_gelu=use_gelu, use_bias=use_bias, compute_dtype=cdt)

    out2 = pl.pallas_call(
        kernel,
        out_shape=jax.ShapeDtypeStruct((M, out_dim), out_dtype),
        grid=grid,
        in_specs=in_specs,
        out_specs=pl.BlockSpec((tm, out_dim), lambda i: (i, 0)),
        compiler_params=pltpu.CompilerParams(
            dimension_semantics=("parallel",),
            vmem_limit_bytes=vmem_limit,
        ),
        cost_estimate=cost,
    )(*operands)

    return out2.reshape(*lead, out_dim)


# ---------------------------------------------------------------------------
# Reference + init helpers for the self-test
# ---------------------------------------------------------------------------

def _kaiming_uniform(key, shape, fan_in, a=math.sqrt(5)):
    # matches torch nn.init.kaiming_uniform_(w, a=sqrt(5)): bound = gain*sqrt(3/fan_in)
    gain = math.sqrt(2.0 / (1.0 + a * a))
    bound = gain * math.sqrt(3.0 / fan_in)
    return jax.random.uniform(key, shape, minval=-bound, maxval=bound, dtype=jnp.float32)


def _reference(x, w1_t, w2_t, b2, structured_type):
    h = x @ w1_t
    if structured_type == "adapter":
        h = jax.nn.gelu(h, approximate=False)
    out = h @ w2_t
    if b2 is not None:
        out = out + b2
    return out


if __name__ == "__main__":
    key = jax.random.PRNGKey(0)
    k_x, k_w1, k_w2, k_x2, k_w1b, k_w2b, k_b = jax.random.split(key, 7)

    # ------------------------------------------------------------------
    # 1) 'lora' init exactly as in the module: W1 kaiming_uniform(a=sqrt(5)), W2 zeros.
    # ------------------------------------------------------------------
    batch, seq, in_dim, low_rank_dim, out_dim = 2, 8, 32, 8, 32
    x = jax.random.normal(k_x, (batch, seq, in_dim), dtype=jnp.float32)
    # torch Linear weight is (out_features, in_features); we store the transpose.
    w1 = _kaiming_uniform(k_w1, (low_rank_dim, in_dim), fan_in=in_dim)    # (r, in)
    w2 = jnp.zeros((out_dim, low_rank_dim), jnp.float32)                  # (out, r) == 0
    w1_t, w2_t = w1.T, w2.T

    y = structured_tuning_forward(x, w1_t, w2_t, None, structured_type="lora")
    y = jax.block_until_ready(y)
    y_ref = _reference(x, w1_t, w2_t, None, "lora")
    assert y.shape == (batch, seq, out_dim)
    assert jnp.allclose(y, y_ref, atol=1e-5), "lora (zero-init W2) mismatch"

    # ------------------------------------------------------------------
    # 2) 'adapter' path: nonzero W2 + GELU + bias, f32, tight tolerance.
    # ------------------------------------------------------------------
    w2_nz = _kaiming_uniform(k_w2, (out_dim, low_rank_dim), fan_in=low_rank_dim)
    b2 = jnp.linspace(-0.5, 0.5, out_dim, dtype=jnp.float32)
    y2 = structured_tuning_forward(x, w1_t, w2_nz.T, b2, structured_type="adapter")
    y2 = jax.block_until_ready(y2)
    y2_ref = _reference(x, w1_t, w2_nz.T, b2, "adapter")
    assert jnp.allclose(y2, y2_ref, atol=1e-4, rtol=1e-4), "adapter path mismatch"

    # ------------------------------------------------------------------
    # 3) 'lora_bias' path with ragged token count (M=13 -> partial last block).
    # ------------------------------------------------------------------
    x_r = jax.random.normal(k_x2, (1, 13, in_dim), dtype=jnp.float32)
    y3 = structured_tuning_forward(x_r, w1_t, w2_nz.T, b2, structured_type="lora_bias")
    y3 = jax.block_until_ready(y3)
    y3_ref = _reference(x_r, w1_t, w2_nz.T, b2, "lora_bias")
    assert y3.shape == (1, 13, out_dim)
    assert jnp.allclose(y3, y3_ref, atol=1e-4, rtol=1e-4), "ragged lora_bias mismatch"

    # ------------------------------------------------------------------
    # 4) bf16-compute path: x stays f32 in HBM, cast in-kernel; weights cast in wrapper.
    # ------------------------------------------------------------------
    D_in, R, D_out, S = 128, 16, 128, 64
    xb = jax.random.normal(k_x, (2, S, D_in), dtype=jnp.float32)
    w1b = _kaiming_uniform(k_w1b, (R, D_in), fan_in=D_in).T               # (D_in, R)
    w2b = _kaiming_uniform(k_w2b, (D_out, R), fan_in=R).T                 # (R, D_out)
    y4 = structured_tuning_forward(xb, w1b, w2b, None, structured_type="lora",
                                   compute_dtype=jnp.bfloat16)
    y4 = jax.block_until_ready(y4)
    xb16 = xb.astype(jnp.bfloat16).astype(jnp.float32)
    w1b16 = w1b.astype(jnp.bfloat16).astype(jnp.float32)
    w2b16 = w2b.astype(jnp.bfloat16).astype(jnp.float32)
    y4_ref = _reference(xb16, w1b16, w2b16, None, "lora")
    assert jnp.allclose(y4, y4_ref, atol=2e-2, rtol=2e-2), "bf16 compute path mismatch"

    print("KERNEL_OK")
</pallas_src>

<mosaic_0001>
module attributes {stable_mosaic.version = 11 : i64} {
  func.func @_structured_tuning_kernel(%arg0: i32, %arg1: memref<8x32xf32, #tpu.memory_space<vmem>>, %arg2: memref<32x8xf32, #tpu.memory_space<vmem>>, %arg3: memref<8x32xf32, #tpu.memory_space<vmem>>, %arg4: memref<8x32xf32, #tpu.memory_space<vmem>>) attributes {dimension_semantics = [#tpu.dimension_semantics<parallel>], iteration_bounds = array<i64: 2>, scalar_prefetch = 0 : i64, scratch_operands = 0 : i64, tpu.core_type = #tpu.core_type<tc>, window_params = [{transform_indices = @transform_0, window_bounds = array<i64: 8, 32>}, {pipeline_mode = #tpu.pipeline_mode<synchronous>, transform_indices = @transform_1, window_bounds = array<i64: 32, 8>}, {pipeline_mode = #tpu.pipeline_mode<synchronous>, transform_indices = @transform_2, window_bounds = array<i64: 8, 32>}, {transform_indices = @transform_3, window_bounds = array<i64: 8, 32>}]} {
    %c0 = arith.constant 0 : index
    %c0_0 = arith.constant 0 : index
    %0 = vector.load %arg1[%c0, %c0_0] : memref<8x32xf32, #tpu.memory_space<vmem>>, vector<8x32xf32>
    %c0_1 = arith.constant 0 : index
    %c0_2 = arith.constant 0 : index
    %1 = vector.load %arg2[%c0_1, %c0_2] : memref<32x8xf32, #tpu.memory_space<vmem>>, vector<32x8xf32>
    %cst = arith.constant dense<0.000000e+00> : vector<8x8xf32>
    %2 = tpu.matmul %0, %1, %cst {dimension_numbers = #tpu.dot_dimension_numbers<[1], [0], [0], [1], [0, 0, 1, 1], [], []>} : vector<8x32xf32>, vector<32x8xf32>, vector<8x8xf32> -> vector<8x8xf32>
    %c0_3 = arith.constant 0 : index
    %c0_4 = arith.constant 0 : index
    %3 = vector.load %arg3[%c0_3, %c0_4] : memref<8x32xf32, #tpu.memory_space<vmem>>, vector<8x32xf32>
    %cst_5 = arith.constant dense<0.000000e+00> : vector<8x32xf32>
    %4 = tpu.matmul %2, %3, %cst_5 {dimension_numbers = #tpu.dot_dimension_numbers<[1], [0], [0], [1], [0, 0, 1, 1], [], []>} : vector<8x8xf32>, vector<8x32xf32>, vector<8x32xf32> -> vector<8x32xf32>
    %c0_6 = arith.constant 0 : index
    %c0_7 = arith.constant 0 : index
    %5 = vector.load %arg4[%c0_6, %c0_7] : memref<8x32xf32, #tpu.memory_space<vmem>>, vector<8x32xf32>
    tpu.vector_store %arg4[%c0_6, %c0_7], %4 {strides = array<i32>} : memref<8x32xf32, #tpu.memory_space<vmem>>, vector<8x32xf32>,
    return
  }
  func.func @transform_0(%arg0: i32) -> (i32, i32) {
    %c0_i32 = arith.constant 0 : i32
    %c0_i32_0 = arith.constant 0 : i32
    return %arg0, %c0_i32 : i32, i32
  }
  func.func @transform_1(%arg0: i32) -> (i32, i32) {
    %c0_i32 = arith.constant 0 : i32
    %c0_i32_0 = arith.constant 0 : i32
    %c0_i32_1 = arith.constant 0 : i32
    return %c0_i32, %c0_i32_0 : i32, i32
  }
  func.func @transform_2(%arg0: i32) -> (i32, i32) {
    %c0_i32 = arith.constant 0 : i32
    %c0_i32_0 = arith.constant 0 : i32
    %c0_i32_1 = arith.constant 0 : i32
    return %c0_i32, %c0_i32_0 : i32, i32
  }
  func.func @transform_3(%arg0: i32) -> (i32, i32) {
    %c0_i32 = arith.constant 0 : i32
    %c0_i32_0 = arith.constant 0 : i32
    return %arg0, %c0_i32 : i32, i32
  }
}

</mosaic_0001>

<bundles_post_ra>
// kernel: tpu_custom_call.1
= control target key start
LH: loop header
LB: loop body
LE: loop exit
PB: predicated region body
PF: predicated region fallthrough
CT: control target
= control target key end

     0   :  { %8 = vsyncpa [#allocation3], 0  ;;  %s671_s0 = inlined_call_operand.vmem [shape: f32[16,32], index: 0, kind: input, shape index: {}]   ;;  %s672_s1 = inlined_call_operand.vmem [shape: f32[32,8], index: 1, kind: input, shape index: {}]   ;;  %s673_s2 = inlined_call_operand.vmem [shape: f32[8,32], index: 2, kind: input, shape index: {}]   ;;  %s674_s3 = inlined_call_operand.hbm [shape: f32[16,32], index: 3, kind: output, shape index: {}]  }
   0x1   :  { %10 = vsyncpa [#allocation3 + $0x1], 0  ;;  %s555_s12 = smov 0   ;;  %s557_s13 = smov 0  }
   0x2   :  { %s559_s14 = smov 0   ;;  %s561_s15 = smov 0  }
   0x3 LB: > { %s576_s16 = sadd.s32 4294967295, %s530_s15   ;;  %s394_s17 = sadd.s32 4294967294, %s530_s15   ;;  %s530_s15 = sphi %s561_s15, %s680_s15   ;;  %s526_s14 = sphi %s559_s14, %s679_s14   ;;  %s522_s13 = sphi %s557_s13, %s678_s13   ;;  %s518_s12 = sphi %s555_s12, %s677_s12  }
   0x4   : > { %s580_s18 = sadd.s32 1, %s530_s15   ;;  %s91_s19 = sadd.s32 1, %s526_s14 }
   0x5   : > { %s88_s20 = ssub.s32 %s530_s15, %s580_s18  ;;  %p101_p0 = scmp.ne.s32.totalorder %s526_s14, %s522_s13 }
   0x6   : > { %p89_p1 = scmp.eq.s32.totalorder %s88_s20, 0  ;;  %p102_p2 = scmp.eq.s32.totalorder %s576_s16, 1 }
   0x7   : > { %p107_p3 = scmp.ne.s32.totalorder %s522_s13, %s518_s12  ;;  %p108_p4 = scmp.eq.s32.totalorder %s394_s17, 1 }
   0x8   : > { %s591_s21 = scalar_select %p89_p1, %s526_s14, %s91_s19  }
   0x9   : > { %p593_p5 = por %p102_p2, %p101_p0  ;;  %p597_p6 = por %p108_p4, %p107_p3 }
   0xa   : > { %p397_p7 = scmp.ge.s32.totalorder %s530_s15, 1  ;;  %p139_p8 = scmp.lt.s32.totalorder %s530_s15, 3 }
   0xc   : > { %p140_p9 = pnand %p397_p7, %p139_p8 }
   0xd   : > { %p162_p10 = scmp.lt.s32.totalorder (!%p140_p9), %s576_s16, 1  ;;  %s159_s17 = sand.u32 (!%p140_p9), 1, %s522_s13  }
   0xe   : > { %143 = sbr.rel (%p140_p9) target bundleno = 428 (0x1ac), region = 32  ;;  %s398_s19 = sshll.u32 (!%p140_p9), %s159_s17, 3 }
   0xf   : > { %s403_s20 = sshll.u32 (!%p140_p9), %s576_s16, 7  ;;  %s161_s24 = scalar_lea.vmem (!%p140_p9), [#allocation2], %s398_s19 }
  0x10   : > { %s335_s25 = sshll.u32 (!%p140_p9), %s161_s24, 4  ;;  %s322_s29 = scalar_lea.sflag (!%p140_p9), [#allocation3], %s159_s17  ;;  %s631_s25 = int_to_ptr.vmem [resolvable:$true] %s335_s25 }
  0x11   : > { %s470_s30 = scalar_lea.vmem (!%p140_p9), %s631_s25, 128 }
  0x12   : > { %p471_p11 = scmp.ne.s32.totalorder (!%p140_p9), %s631_s25, %s470_s30 }
  0x13   : > { %v170_v0 = vld [vmem:[%s672_s1 + $0x18] sm:$0xff]  ;;  %v532_v1 = vmov 0.0   ;;  %v169_v2 = vld [vmem:[%s672_s1 + $0x10] sm:$0xff]  ;;  %vm533_vm0 = vmmov 0   ;;  %s163_s28 = scalar_select %p162_p10, %s576_s16, 1  ;;  %v168_v3 = vld [vmem:[%s672_s1 + $0x8] sm:$0xff] }
  0x14   : > { %413 = vmatprep.subr.mxu0 %v532_v1  ;;  %421 = vmatprep.mubr.msk.f32.mxu0 %vm533_vm0, %v532_v1  ;;  %v167_v4 = vld [vmem:[%s672_s1] sm:$0xff]  ;;  %vm171_vm1 = vcmask 261120   ;;  %vm246_vm2 = vcmask 64512   ;;  %p472_p12 = pnand %p471_p11, %p593_p5  ;;  %s534_s16 = smov [#allocation2]  }
  0x15   : > { %414 = vmatpush3.msra.mxu0 %v170_v0  ;;  %424 = vmatprep.subr.mxu1 %v532_v1  ;;  %s399_s4 = sshll.u32 %s163_s28, 3  ;;  %v245_v6 = vld [vmem:[%s673_s2] sm:$0xff]  ;;  %s629_s28 = scalar_lea.hbm %s674_s3, %s403_s20 }
  0x16   : > { %415 = vmatprep.subr.mxu0 %v532_v1  ;;  %426 = vmatprep.mubr.msk.f32.mxu1 %vm533_vm0, %v532_v1  ;;  %s165_s9 = scalar_lea.vmem %s671_s0, %s399_s4  ;;  %p473_p13 = pneg %p472_p12 }
  0x17   : > { %416 = vmatpush3.msra.mxu0 %v169_v2  ;;  %v166_v5 = vld [vmem:[%s165_s9] sm:$0xff]  ;;  %425 = vmatpush3.msra.mxu1 %v245_v6  ;;  %s474_s4 = sshll.u32 %s534_s16, 4  ;;  %s475_s4 = int_to_ptr.vmem [resolvable:$false] %s474_s4 }
  0x18   : > { %417 = vmatprep.subr.mxu0 %v532_v1  ;;  %s476_s5 = scalar_lea.vmem %s475_s4, 256  ;;  %p477_p0 = scmp.lt.s32.totalorder %s631_s25, %s475_s4 }
  0x19   : > { %418 = vmatpush3.msra.mxu0 %v168_v3  ;;  %p478_p1 = scmp.lt.s32.totalorder %s476_s5, %s470_s30 }
  0x1a   : > { %419 = vmatprep.subr.mxu0 %v532_v1 }
  0x1b   : > { %420 = vmatpush3.msra.mxu0 %v167_v4  ;;  %p479_p2 = por %p478_p1, %p477_p0 }
  0x1c   : > { %422 = vmatmul.mubr.msk.f32.vlgmr.msra.gmra.mxu0 %vm171_vm1, %v166_v5 }
  0x1d   : > { %p480_p3 = pnand %p479_p2, %p473_p13 }
  0xdc   : > { %v241_v7 = vpop.f32.mrf.mxu0 }
  0xdd   : > { %427 = vmatmul.mubr.msk.f32.vlgmr.msra.gmra.mxu1 %vm246_vm2, %v241_v7 }
  0xde   : > { %v423_v8 = vpop.f32.mrf.mxu0 }
 0x19d   : > { %v316_v9 = vpop.f32.mrf.mxu1 }
 0x19e   : > { %320 = vst.msk [vmem:[%s161_s24] sm:$0xff] %vm171_vm1, %v316_v9 }
 0x19f   : > { %v428_v10 = vpop.f32.mrf.mxu1 }
 0x1a0   : > { %483 = shalt.err (!%p480_p3)
}
 0x1a1   : > { %s484_s6 = scalar_lea.hbm %s629_s28, 128  ;;  %s488_s9 = scalar_lea.hbm %s674_s3, 256 }
 0x1a2   : > { %p485_p4 = scmp.ne.s32.totalorder %s629_s28, %s484_s6  ;;  %p489_p9 = scmp.lt.s32.totalorder %s629_s28, %s674_s3 }
 0x1a3   : > { %p490_p10 = scmp.lt.s32.totalorder %s488_s9, %s484_s6 }
 0x1a4   : > { %p486_p7 = pnand %p485_p4, %p593_p5 }
 0x1a5   : > { %p491_p11 = por %p490_p10, %p489_p9 }
 0x1a6   : > { %p487_p8 = pneg %p486_p7 }
 0x1a8   : > { %p492_p12 = pnand %p491_p11, %p487_p8 }
 0x1aa   : > { %495 = shalt.err (!%p492_p12)
}
 0x1ab   : > { %429 = dma.vmem_to_hbm [thread:$0]  (%p593_p5), %s631_s25, 128, %s629_s28, %s322_s29  }
 0x1ac PF: > { %p435_p13 = scmp.ge.s32.totalorder %s530_s15, 2  ;;  %s347_s17 = sand.u32 1, %s518_s12  }
 0x1ad   : > { %s348_s19 = scalar_lea.sflag [#allocation3], %s347_s17 }
 0x1ae   : > { %p432_p0 = pnand %p435_p13, %p597_p6 }
 0x1b0   : > { %p433_p1 = pneg %p432_p0 }
 0x1b2   : > { %513 = dma.done.wait (%p433_p1), %s348_s19, 128  }
 0x1b3   : > { %515 = vsyncadd (%p433_p1), %s348_s19, 4294967168  ;;  %p13_p2 = scmp.ge.s32.totalorder %s580_s18, 4   ;;  %s677_s12 = smov %s522_s13 }
 0x1b4   : > { %s678_s13 = smov %s526_s14  ;;  %s679_s14 = smov %s591_s21 }
 0x1b5   : > { %s680_s15 = smov %s580_s18  ;;  %15 = sbr.rel (!%p13_p2) target bundleno = 3 (0x3), region = 67 }
 0x1ba   :  { %353 = vsyncpa [#allocation3], 1 }
 0x1bb   :  { %355 = vsyncpa [#allocation3 + $0x1], 1 }

</bundles_post_ra>
